<compile_context>
chip_gen: v5e
topology: v5e:2x2
jax: 0.10.0
libtpu: 0.0.40
codegen_flags: <defaults>
</compile_context>

<pallas_src>
import math

import jax
import jax.numpy as jnp
from jax.experimental import pallas as pl
from jax.experimental.pallas import tpu as pltpu


def _data_embedding_kernel(x_ref, w_ref, pe_ref, o_ref):
    # x_ref : (Bt, Lf, Kf)  channel-stacked (and lane-folded) input rows
    # w_ref : (Kf, Nf)      stacked / block-diagonal conv weight (resident)
    # pe_ref: (Lf, Nf)      folded positional-encoding rows (resident)
    # o_ref : (Bt, Lf, Nf)
    w = w_ref[...]
    pe = pe_ref[...]
    # Static (small) unrolled loop over the batch tile: one MXU matmul per
    # element with K = fold*3*c_in, fused PE add, single epilogue store.
    for b in range(o_ref.shape[0]):
        acc = jnp.dot(x_ref[b], w, preferred_element_type=jnp.float32)
        o_ref[b] = (acc + pe).astype(o_ref.dtype)
    # TODO(synk): training-mode dropout (p=0.05) omitted; eval-mode dropout is identity.


def make_pe_table(d_model: int, max_len: int = 5000) -> jnp.ndarray:
    """Builds the (max_len, d_model) PE buffer exactly as PositionalEmbedding.__init__."""
    position = jnp.arange(max_len, dtype=jnp.float32)[:, None]                 # (max_len, 1)
    div_term = jnp.exp(jnp.arange(0, d_model, 2, dtype=jnp.float32)
                       * (-math.log(10000.0) / d_model))                       # (ceil(d/2),)
    pe = jnp.zeros((max_len, d_model), dtype=jnp.float32)
    pe = pe.at[:, 0::2].set(jnp.sin(position * div_term))
    pe = pe.at[:, 1::2].set(jnp.cos(position * div_term[: d_model // 2]))      # handles odd d_model
    return pe


def _pick_fold(seq_len: int, d_model: int) -> int:
    """Fold factor so the output last dim is a lane-dense multiple of 128."""
    if d_model >= 128 or 128 % d_model != 0:
        return 1
    f = 128 // d_model
    return f if seq_len % f == 0 else 1


def _pick_batch_tile(B: int, Lf: int, Kf: int, Nf: int,
                     vmem_budget: int = 10 * 1024 * 1024) -> int:
    """Largest divisor of B whose double-buffered blocks fit a conservative VMEM budget
    (safe under the default scoped limit on v5e/v6e/v7x), keeping >= 2 grid steps."""
    per_b = 2 * (Lf * Kf + Lf * Nf) * 4          # double-buffered in + out, f32-conservative
    bt = max(1, min(B, vmem_budget // max(per_b, 1)))
    if B >= 2:
        bt = max(1, min(bt, B // 2))             # >= 2 grid steps for megacore sharding
    while B % bt != 0:                           # full blocks only
        bt -= 1
    return max(bt, 1)


def prepare_data_embedding_params(conv_weight: jnp.ndarray,
                                  seq_len: int,
                                  max_len: int = 5000):
    """Parameter-load-time preparation (hoisted out of the forward pass).

    conv_weight: (d_model, c_in, 3) PyTorch Conv1d weight layout.
    Returns (w_mat, pe_fold, fold):
      w_mat  : (fold*3*c_in, fold*d_model) stacked (block-diagonal) conv weight
      pe_fold: (seq_len // fold, fold*d_model) positional-encoding rows
    """
    d_model, c_in, k = conv_weight.shape
    assert k == 3, "TokenEmbedding uses kernel_size=3"
    fold = _pick_fold(seq_len, d_model)
    # Stacked weight: row (tap*c_in + c) maps (tap, channel) -> output channel.
    w_stacked = jnp.transpose(conv_weight, (2, 1, 0)).reshape(3 * c_in, d_model)
    if fold > 1:
        w_mat = jnp.kron(jnp.eye(fold, dtype=w_stacked.dtype), w_stacked)
    else:
        w_mat = w_stacked
    pe = make_pe_table(d_model, max_len)[:seq_len]                             # (L, D)
    pe_fold = pe.reshape(seq_len // fold, fold * d_model)                      # (Lf, Nf)
    return w_mat, pe_fold, fold


def data_embedding_forward(x: jnp.ndarray,
                           w_mat: jnp.ndarray,
                           pe_fold: jnp.ndarray,
                           fold: int,
                           out_dtype=None) -> jnp.ndarray:
    """x: (B, L, c_in).  Returns (B, L, d_model) = Conv1d_circular(x) + PE (eval mode)."""
    B, L, c_in = x.shape
    Kf, Nf = w_mat.shape
    d_model = Nf // fold
    Lf = L // fold
    out_dtype = out_dtype or x.dtype

    # Circular-pad + channel-stack: x_stacked[b, l, tap*c_in + c] = x[b, (l-1+tap) mod L, c].
    xm1 = jnp.roll(x, 1, axis=1)
    xp1 = jnp.roll(x, -1, axis=1)
    x_stacked = jnp.concatenate([xm1, x, xp1], axis=2)                         # (B, L, 3*c_in)
    x_fold = x_stacked.reshape(B, Lf, fold * 3 * c_in)                         # (B, Lf, Kf)

    bt = _pick_batch_tile(B, Lf, Kf, Nf)

    out = pl.pallas_call(
        _data_embedding_kernel,
        out_shape=jax.ShapeDtypeStruct((B, Lf, Nf), out_dtype),
        grid_spec=pltpu.PrefetchScalarGridSpec(
            num_scalar_prefetch=0,
            grid=(B // bt,),
            in_specs=[
                pl.BlockSpec((bt, Lf, Kf), lambda i: (i, 0, 0)),
                pl.BlockSpec((Kf, Nf), lambda i: (0, 0)),    # resident weights
                pl.BlockSpec((Lf, Nf), lambda i: (0, 0)),    # resident PE rows (pre-sliced)
            ],
            out_specs=pl.BlockSpec((bt, Lf, Nf), lambda i: (i, 0, 0)),
        ),
        compiler_params=pltpu.CompilerParams(
            dimension_semantics=("parallel",),
        ),
    )(x_fold, w_mat, pe_fold)
    return out.reshape(B, L, d_model)


if __name__ == "__main__":
    # Small shapes consistent with the module: batch=2, seq=8, c_in=4, d_model=32.
    B, L, c_in, d_model = 2, 8, 4, 32
    max_len = 64  # small synthetic buffer (>= L); semantics identical to 5000

    key = jax.random.PRNGKey(0)
    kx, kw = jax.random.split(key)
    x = jax.random.normal(kx, (B, L, c_in), dtype=jnp.float32)

    # kaiming_normal_(mode='fan_in', nonlinearity='leaky_relu') equivalent init.
    fan_in = c_in * 3
    gain = math.sqrt(2.0 / (1.0 + 0.01 ** 2))
    conv_weight = (gain / math.sqrt(fan_in)) * jax.random.normal(
        kw, (d_model, c_in, 3), dtype=jnp.float32)

    # Parameter-load-time prep (hoisted out of the forward).
    w_mat, pe_fold, fold = prepare_data_embedding_params(conv_weight, L, max_len)

    out = data_embedding_forward(x, w_mat, pe_fold, fold)
    out = jax.block_until_ready(out)

    # Pure-JAX reference (high precision) for correctness.
    pe_table = make_pe_table(d_model, max_len)
    xp = jnp.concatenate([x[:, -1:, :], x, x[:, :1, :]], axis=1)
    w_taps = jnp.transpose(conv_weight, (2, 1, 0))
    hi = jax.lax.Precision.HIGHEST
    ref = (jnp.einsum("blc,cd->bld", xp[:, 0:L], w_taps[0], precision=hi)
           + jnp.einsum("blc,cd->bld", xp[:, 1:L + 1], w_taps[1], precision=hi)
           + jnp.einsum("blc,cd->bld", xp[:, 2:L + 2], w_taps[2], precision=hi)
           + pe_table[None, :L, :])

    assert out.shape == (B, L, d_model)
    assert jnp.allclose(out, ref, atol=2e-2, rtol=2e-2), "mismatch vs reference"

    print("KERNEL_OK")
</pallas_src>

<mosaic_0001>
module attributes {stable_mosaic.version = 11 : i64} {
  func.func @_data_embedding_kernel(%arg0: i32, %arg1: memref<1x2x48xf32, #tpu.memory_space<vmem>>, %arg2: memref<48x128xf32, #tpu.memory_space<vmem>>, %arg3: memref<2x128xf32, #tpu.memory_space<vmem>>, %arg4: memref<1x2x128xf32, #tpu.memory_space<vmem>>) attributes {dimension_semantics = [#tpu.dimension_semantics<parallel>], iteration_bounds = array<i64: 2>, scalar_prefetch = 0 : i64, scratch_operands = 0 : i64, tpu.core_type = #tpu.core_type<tc>, window_params = [{transform_indices = @transform_0, window_bounds = array<i64: 1, 2, 48>}, {pipeline_mode = #tpu.pipeline_mode<synchronous>, transform_indices = @transform_1, window_bounds = array<i64: 48, 128>}, {pipeline_mode = #tpu.pipeline_mode<synchronous>, transform_indices = @transform_2, window_bounds = array<i64: 2, 128>}, {transform_indices = @transform_3, window_bounds = array<i64: 1, 2, 128>}]} {
    %c0 = arith.constant 0 : index
    %c0_0 = arith.constant 0 : index
    %0 = vector.load %arg2[%c0, %c0_0] : memref<48x128xf32, #tpu.memory_space<vmem>>, vector<48x128xf32>
    %c0_1 = arith.constant 0 : index
    %c0_2 = arith.constant 0 : index
    %1 = vector.load %arg3[%c0_1, %c0_2] : memref<2x128xf32, #tpu.memory_space<vmem>>, vector<2x128xf32>
    %c0_3 = arith.constant 0 : index
    %c0_4 = arith.constant 0 : index
    %c0_5 = arith.constant 0 : index
    %2 = vector.load %arg1[%c0_3, %c0_4, %c0_5] : memref<1x2x48xf32, #tpu.memory_space<vmem>>, vector<1x2x48xf32>
    %3 = vector.shape_cast %2 : vector<1x2x48xf32> to vector<2x48xf32>
    %cst = arith.constant dense<0.000000e+00> : vector<2x128xf32>
    %4 = tpu.matmul %3, %0, %cst {dimension_numbers = #tpu.dot_dimension_numbers<[1], [0], [0], [1], [0, 0, 1, 1], [], []>} : vector<2x48xf32>, vector<48x128xf32>, vector<2x128xf32> -> vector<2x128xf32>
    %5 = arith.addf %4, %1 : vector<2x128xf32>
    %c0_6 = arith.constant 0 : index
    %c0_7 = arith.constant 0 : index
    %c0_8 = arith.constant 0 : index
    %6 = vector.load %arg4[%c0_6, %c0_7, %c0_8] : memref<1x2x128xf32, #tpu.memory_space<vmem>>, vector<1x2x128xf32>
    %7 = vector.shape_cast %6 : vector<1x2x128xf32> to vector<2x128xf32>
    %8 = vector.shape_cast %5 : vector<2x128xf32> to vector<1x2x128xf32>
    tpu.vector_store %arg4[%c0_6, %c0_7, %c0_8], %8 {strides = array<i32>} : memref<1x2x128xf32, #tpu.memory_space<vmem>>, vector<1x2x128xf32>,
    return
  }
  func.func @transform_0(%arg0: i32) -> (i32, i32, i32) {
    %c0_i32 = arith.constant 0 : i32
    %c0_i32_0 = arith.constant 0 : i32
    %c0_i32_1 = arith.constant 0 : i32
    return %arg0, %c0_i32, %c0_i32_0 : i32, i32, i32
  }
  func.func @transform_1(%arg0: i32) -> (i32, i32) {
    %c0_i32 = arith.constant 0 : i32
    %c0_i32_0 = arith.constant 0 : i32
    %c0_i32_1 = arith.constant 0 : i32
    return %c0_i32, %c0_i32_0 : i32, i32
  }
  func.func @transform_2(%arg0: i32) -> (i32, i32) {
    %c0_i32 = arith.constant 0 : i32
    %c0_i32_0 = arith.constant 0 : i32
    %c0_i32_1 = arith.constant 0 : i32
    return %c0_i32, %c0_i32_0 : i32, i32
  }
  func.func @transform_3(%arg0: i32) -> (i32, i32, i32) {
    %c0_i32 = arith.constant 0 : i32
    %c0_i32_0 = arith.constant 0 : i32
    %c0_i32_1 = arith.constant 0 : i32
    return %arg0, %c0_i32, %c0_i32_0 : i32, i32, i32
  }
}

</mosaic_0001>

<bundles_post_ra>
// kernel: tpu_custom_call.1
= control target key start
LH: loop header
LB: loop body
LE: loop exit
PB: predicated region body
PF: predicated region fallthrough
CT: control target
= control target key end

     0   :  { %8 = vsyncpa [#allocation3], 0  ;;  %s774_s0 = inlined_call_operand.hbm [shape: f32[2,2,48], index: 0, kind: input, shape index: {}]   ;;  %s775_s1 = inlined_call_operand.hbm [shape: f32[48,128], index: 1, kind: input, shape index: {}]   ;;  %s776_s2 = inlined_call_operand.hbm [shape: f32[2,128], index: 2, kind: input, shape index: {}]   ;;  %s777_s3 = inlined_call_operand.hbm [shape: f32[2,2,128], index: 3, kind: output, shape index: {}]  }
   0x1   :  { %10 = vsyncpa [#allocation3 + $0x1], 0 }
   0x2   :  { %11 = vsyncpa [#allocation6], 0 }
   0x3   :  { %12 = vsyncpa [#allocation4], 0 }
   0x4   :  { %14 = vsyncpa [#allocation4 + $0x1], 0  ;;  %s629_s12 = smov 0   ;;  %s631_s13 = smov 0  }
   0x5   :  { %s633_s14 = smov 0   ;;  %s635_s15 = smov 0  }
   0x6 LB: > { %s130_s18 = sshll.u32 %s775_s1, 4  ;;  %s653_s19 = sadd.s32 4294967295, %s603_s15   ;;  %s603_s15 = sphi %s635_s15, %s788_s15   ;;  %s599_s14 = sphi %s633_s14, %s787_s14   ;;  %s595_s13 = sphi %s631_s13, %s786_s13   ;;  %s591_s12 = sphi %s629_s12, %s785_s12   ;;  %s131_s18 = int_to_ptr.hbm [resolvable:$true] %s130_s18 }
   0x7   : > { %p358_p0 = scmp.ge.s32.totalorder %s603_s15, 1  ;;  %p41_p1 = scmp.eq.s32.totalorder %s653_s19, 0 }
   0x8   : > { %p119_p2 = scmp.lt.s32.totalorder %s603_s15, 3  ;;  %s605_s21 = smov [#allocation5]  }
   0x9   : > { %s132_s22 = sshll.u32 %s605_s21, 4  ;;  %s145_s25 = sshll.u32 %s776_s2, 4  ;;  %s133_s22 = int_to_ptr.vmem [resolvable:$true] %s132_s22  ;;  %s146_s25 = int_to_ptr.hbm [resolvable:$true] %s145_s25 }
   0xa   : > { %p658_p3 = pnand %p358_p0, %p119_p2  ;;  %s606_s26 = smov [#allocation7]  }
   0xb   : > { %s147_s27 = sshll.u32 %s606_s26, 4  ;;  %s607_s28 = smov 128   ;;  %s148_s27 = int_to_ptr.vmem [resolvable:$true] %s147_s27 }
   0xc   : > { %p386_p4 = pneg %p658_p3  ;;  %s608_s29 = smov 8  }
   0xd   : > { %s357_s30 = sadd.s32 4294967294, %s603_s15   ;;  %s672_s4 = sadd.s32 1, %s603_s15  }
   0xe   : > { %p387_p6 = pnand %p386_p4, %p41_p1  ;;  %s24_s5 = ssub.s32 %s603_s15, %s672_s4 }
   0xf   : > { %s27_s6 = sadd.s32 1, %s599_s14  ;;  %p25_p7 = scmp.eq.s32.totalorder %s24_s5, 0 }
  0x10   : > { %389 = dma.hbm_to_vmem [thread:$0]  (!%p387_p6), %s131_s18, 768, %s133_s22, [#allocation6], %s607_s28, %s607_s28, %s608_s29  }
  0x11   : > { %392 = dma.hbm_to_vmem [thread:$0]  (!%p387_p6), %s146_s25, 32, %s148_s27, [#allocation6]  }
  0x12   : > { %p34_p8 = scmp.ne.s32.totalorder %s599_s14, %s595_s13  ;;  %p35_p9 = scmp.eq.s32.totalorder %s603_s15, 0 }
  0x13   : > { %p40_p10 = scmp.ne.s32.totalorder %s595_s13, %s591_s12  ;;  %p106_p13 = scmp.eq.s32.totalorder %s653_s19, 1 }
  0x14   : > { %s683_s7 = scalar_select %p25_p7, %s599_s14, %s27_s6  }
  0x15   : > { %p685_p11 = por %p35_p9, %p34_p8  ;;  %p691_p12 = por %p41_p1, %p40_p10 }
  0x16   : > { %p112_p0 = scmp.eq.s32.totalorder %s357_s30, 1  ;;  %p403_p2 = scmp.lt.s32.totalorder %s603_s15, 2 }
  0x17   : > { %s158_s10 = sand.u32 1, %s599_s14   ;;  %p698_p4 = por %p106_p13, %p34_p8 }
  0x18   : > { %p702_p6 = por %p112_p0, %p40_p10  ;;  %s362_s17 = sshll.u32 %s158_s10, 1 }
  0x19   : > { %s363_s18 = sshll.u32 %s603_s15, 1  ;;  %s162_s24 = scalar_lea.vmem [#allocation2], %s362_s17 }
  0x1a   : > { %s166_s23 = scalar_lea.hbm %s774_s0, %s363_s18  ;;  %s170_s25 = sshll.u32 %s162_s24, 4  ;;  %s171_s25 = int_to_ptr.vmem [resolvable:$true] %s170_s25 }
  0x1b   : > { %s168_s26 = sshll.u32 %s166_s23, 4  ;;  %p712_p7 = pnand %p403_p2, %p685_p11  ;;  %s169_s26 = int_to_ptr.hbm [resolvable:$true] %s168_s26 }
  0x1c   : > { %s159_s28 = scalar_lea.sflag [#allocation3], %s158_s10  ;;  %s503_s29 = sshra.s32 %s169_s26, 4  ;;  %s504_s29 = int_to_ptr.hbm [resolvable:$true] %s503_s29 }
  0x1d   : > { %s505_s30 = scalar_lea.hbm %s504_s29, 2  ;;  %p507_p9 = pneg %p712_p7 }
  0x1e   : > { %p506_p8 = scmp.ne.s32.totalorder %s504_s29, %s505_s30  ;;  %s510_s17 = scalar_lea.hbm %s774_s0, 4 }
  0x1f   : > { %p511_p11 = scmp.lt.s32.totalorder %s504_s29, %s774_s0  ;;  %p512_p0 = scmp.lt.s32.totalorder %s510_s17, %s505_s30 }
  0x20   : > { %p508_p10 = pnand %p507_p9, %p506_p8 }
  0x21   : > { %p513_p2 = por %p512_p0, %p511_p11 }
  0x22   : > { %p509_p13 = pneg %p508_p10 }
  0x24   : > { %p514_p5 = pnand %p513_p2, %p509_p13 }
  0x26   : > { %517 = shalt.err (!%p514_p5)
}
  0x27   : > { %396 = dma.hbm_to_vmem [thread:$0]  (!%p712_p7), %s169_s26, 32, %s171_s25, %s159_s28  }
  0x28   : > { %179 = sbr.rel (%p658_p3) target bundleno = 191 (0xbf), region = 32  ;;  %s729_s10 = sand.u32 (!%p658_p3), 1, %s595_s13  }
  0x29   : > { %s365_s21 = sshll.u32 (!%p658_p3), %s729_s10, 1  ;;  %s182_s22 = scalar_lea.sflag (!%p658_p3), [#allocation3], %s729_s10 }
  0x2a   : > { %s185_s23 = scalar_lea.vmem (!%p658_p3), [#allocation2], %s365_s21 }
  0x2d   : > { %578 = dma.done.wait (%p691_p12), %s182_s22, 32  }
  0x2e   : > { %580 = vsyncadd (%p691_p12), %s182_s22, 4294967264 }
  0x2f   : > { %582 = dma.done.wait (%p41_p1), [#allocation6], 800  }
  0x30   : > { %584 = vsyncadd (%p41_p1), [#allocation6], 4294966496  ;;  %v224_v0 = vld [vmem:[#allocation5 + $0x28] sm:$0xff]  ;;  %v223_v1 = vld [vmem:[#allocation5 + $0x20] sm:$0xff]  ;;  %vm227_vm0 = vcmask 392192   ;;  %s371_s20 = sshll.u32 %s653_s19, 1 }
  0x31   : > { %241 = vmatpush.msra.mxu0 %v224_v0  ;;  %v222_v2 = vld [vmem:[#allocation5 + $0x18] sm:$0xff]  ;;  %v221_v3 = vld [vmem:[#allocation5 + $0x10] sm:$0xff]  ;;  %v220_v4 = vld [vmem:[#allocation5 + $0x8] sm:$0xff]  ;;  %s263_s25 = scalar_lea.hbm %s777_s3, %s371_s20  ;;  %s218_s26 = scalar_lea.vmem [#allocation8], %s365_s21 }
  0x32   : > { %v219_v5 = vld [vmem:[#allocation5] sm:$0xff]  ;;  %v226_v6 = vld [vmem:[%s185_s23] sm:$0x3]  ;;  %v225_v7 = vld [vmem:[#allocation7] sm:$0x3]  ;;  %s265_s27 = sshll.u32 %s218_s26, 4  ;;  %s266_s27 = int_to_ptr.vmem [resolvable:$true] %s265_s27 }
  0x33   : > { %242 = vmatpush.msra.mxu0 %v223_v1  ;;  %s267_s28 = sshll.u32 %s263_s25, 4  ;;  %s253_s29 = scalar_lea.sflag [#allocation4], %s729_s10  ;;  %s268_s28 = int_to_ptr.hbm [resolvable:$true] %s267_s28 }
  0x34   : > { %s547_s30 = sshra.s32 %s268_s28, 4  ;;  %s553_s17 = scalar_lea.hbm %s777_s3, 4  ;;  %s548_s30 = int_to_ptr.hbm [resolvable:$true] %s547_s30 }
  0x35   : > { %243 = vmatpush.msra.mxu0 %v222_v2  ;;  %s549_s5 = scalar_lea.hbm %s548_s30, 2  ;;  %p554_p12 = scmp.lt.s32.totalorder %s548_s30, %s777_s3 }
  0x36   : > { %p550_p1 = scmp.ne.s32.totalorder %s548_s30, %s549_s5  ;;  %p555_p7 = scmp.lt.s32.totalorder %s553_s17, %s549_s5 }
  0x37   : > { %244 = vmatpush.msra.mxu0 %v221_v3 }
  0x38   : > { %p551_p3 = pnand %p550_p1, %p698_p4  ;;  %p556_p8 = por %p555_p7, %p554_p12 }
  0x39   : > { %245 = vmatpush.msra.mxu0 %v220_v4 }
  0x3a   : > { %p552_p5 = pneg %p551_p3 }
  0x3b   : > { %246 = vmatpush.msra.mxu0 %v219_v5 }
  0x3c   : > { %369 = vmatmul.msk.f32.vlgmr.msra.gmra.mxu0 %vm227_vm0, %v226_v6  ;;  %p557_p9 = pnand %p556_p8, %p552_p5 }
  0xb9   : > { %v248_v8 = vpop.f32.mrf.mxu0 }
  0xba   : > { %v249_v9 = vadd.f32 %v248_v8, %v225_v7 }
  0xbc   : > { %251 = vst [vmem:[%s218_s26] sm:$0x3] %v249_v9 }
  0xbd   : > { %560 = shalt.err (!%p557_p9)
}
  0xbe   : > { %384 = dma.vmem_to_hbm [thread:$0]  (%p698_p4), %s266_s27, 32, %s268_s28, %s253_s29  }
  0xbf PF: > { %s279_s10 = sand.u32 1, %s591_s12   ;;  %p784_p10 = scmp.ge.s32.totalorder %s603_s15, 2 }
  0xc0   : > { %s280_s21 = scalar_lea.sflag [#allocation4], %s279_s10 }
  0xc1   : > { %p398_p13 = pnand %p784_p10, %p702_p6 }
  0xc3   : > { %p399_p11 = pneg %p398_p13 }
  0xc5   : > { %586 = dma.done.wait (%p399_p11), %s280_s21, 32  }
  0xc6   : > { %588 = vsyncadd (%p399_p11), %s280_s21, 4294967264  ;;  %p17_p0 = scmp.ge.s32.totalorder %s672_s4, 4   ;;  %s785_s12 = smov %s595_s13 }
  0xc7   : > { %s786_s13 = smov %s599_s14  ;;  %s787_s14 = smov %s683_s7 }
  0xc8   : > { %s788_s15 = smov %s672_s4  ;;  %19 = sbr.rel (!%p17_p0) target bundleno = 6 (0x6), region = 85 }
  0xcd   :  { %286 = vsyncpa [#allocation3], 1 }
  0xce   :  { %288 = vsyncpa [#allocation3 + $0x1], 1 }
  0xcf   :  { %289 = vsyncpa [#allocation6], 1 }
  0xd0   :  { %290 = vsyncpa [#allocation4], 1 }
  0xd1   :  { %292 = vsyncpa [#allocation4 + $0x1], 1 }

</bundles_post_ra>
